<compile_context>
chip_gen: v6e
topology: v6e:2x2x1
jax: 0.10.0
libtpu: 0.0.40
codegen_flags: <defaults>
</compile_context>

<pallas_src>
import functools

import jax
import jax.numpy as jnp
from jax.experimental import pallas as pl
from jax.experimental.pallas import tpu as pltpu


# ----------------------------------------------------------------------------
# Kernel: processes a block of `tb` batch elements per grid step.
#   static_ref : (tb, S, H)  all_hidden, sequence-major, bf16
#   dec_ref    : (tb, H)     origin hidden, bf16
#   was_ref    : (H, H)      Attention.W[:, :H]^T            (static half)
#   wdec_ref   : (H, 2H)     [Attention.W[:, H:]^T | fc1^T dec-half]  (fused)
#   va_ref     : (1, H)      Attention.v  (f32, VPU operand)
#   w1b_ref    : (H, H)      fc1.weight^T[H:, :]             (context half)
#   b1_ref     : (1, H)      fc1.bias (f32)
#   w2_ref     : (H, H)      fc2.weight^T
#   b2_ref     : (1, H)      fc2.bias (f32)
#   vp_ref     : (1, H)      Pointer.v    (f32, VPU operand)
#   out_ref    : (tb, S)     output probs (f32)
# ----------------------------------------------------------------------------
def pointer_kernel(static_ref, dec_ref, was_ref, wdec_ref, va_ref,
                   w1b_ref, b1_ref, w2_ref, b2_ref, vp_ref,
                   out_ref, *, act_dtype):
    f32 = jnp.float32
    tb, S, H = static_ref.shape

    static3 = static_ref[...]                          # (tb, S, H) bf16
    static2 = static3.reshape(tb * S, H)               # layout-preserving merge
    dec = dec_ref[...]                                 # (tb, H)    bf16

    # ---- MXU work: static attention projection (M = tb*S) and the fused
    #      decoder-side matmul [attn-dec | fc1-dec] (M = tb, N = 2H) ----------
    stat_proj = jnp.dot(static2, was_ref[...],
                        preferred_element_type=f32)            # (tb*S, H)
    dec_both = jnp.dot(dec, wdec_ref[...],
                       preferred_element_type=f32)             # (tb, 2H)
    dec_proj = dec_both[:, :H]                                  # attention half
    fc1_dec = dec_both[:, H:]                                   # fc1 half

    # ---- attention: tanh (EUP), then VPU multiply + lane reduce over H ------
    wh = jnp.tanh((stat_proj.reshape(tb, S, H)
                   + dec_proj[:, None, :]).astype(act_dtype))   # (tb, S, H)
    logits = jnp.sum(wh.astype(f32) * va_ref[...].reshape(1, 1, H),
                     axis=-1)                                   # (tb, S)

    # softmax over the sequence (lane) axis; exact reciprocal (tb values only)
    m = jnp.max(logits, axis=-1, keepdims=True)
    e = jnp.exp(logits - m)
    attn = e * (1.0 / jnp.sum(e, axis=-1, keepdims=True))       # (tb, S) f32

    # ---- context: broadcast-multiply + reduce over S in the loaded layout ---
    context = jnp.sum(attn[:, :, None] * static3.astype(f32), axis=1)  # (tb, H)

    # ---- fc1 / fc2 with ReLU (M = tb) ---------------------------------------
    out1 = jnp.maximum(
        fc1_dec
        + jnp.dot(context.astype(w1b_ref.dtype), w1b_ref[...],
                  preferred_element_type=f32)
        + b1_ref[...], 0.0)                                     # (tb, H) f32
    out2 = jnp.maximum(
        jnp.dot(out1.astype(w2_ref.dtype), w2_ref[...],
                preferred_element_type=f32)
        + b2_ref[...], 0.0)                                     # (tb, H) f32

    # ---- probs = v . tanh(all_hidden + output): same tanh + mult/reduce -----
    act = jnp.tanh(static3.astype(act_dtype)
                   + out2.astype(act_dtype)[:, None, :])        # (tb, S, H)
    probs = jnp.sum(act.astype(f32) * vp_ref[...].reshape(1, 1, H),
                    axis=-1)                                    # (tb, S)
    out_ref[...] = probs.astype(out_ref.dtype)


# ----------------------------------------------------------------------------
# Batch-tile selection: sized from a VMEM budget, legal for the BlockSpecs
# (tb == B, or tb a multiple of 8 dividing B), and split in two when possible
# so the parallel grid axis can feed both v7x TensorCores.
# ----------------------------------------------------------------------------
def _pick_block_b(B, S, H, *, act_bytes=2,
                  vmem_budget=20 * 1024 * 1024, cap=2048):
    # per-batch-element working set: bf16 input block (double-buffered) +
    # ~two activation-sized temporaries + f32 projection temporaries.
    per_b = S * H * (2 * 2 + 2 * act_bytes + 8) + 16 * H * 4
    max_tb = max(8, min(cap, vmem_budget // max(per_b, 1)))
    if B <= max_tb:
        half = B // 2
        if half >= 8 and half % 8 == 0:
            return half                       # grid of >=2 steps (v7x megacore)
        return B
    best = 0
    d = 8
    while d <= max_tb:
        if B % d == 0:
            best = d
        d += 8
    return best if best else B                # fall back: single block


# ----------------------------------------------------------------------------
# Wrapper
# ----------------------------------------------------------------------------
def pointer_forward(all_hidden, origin_hidden, params, *,
                    block_b=None, compute_dtype=jnp.bfloat16,
                    activation_dtype=jnp.bfloat16):
    B, H, S = all_hidden.shape
    assert origin_hidden.shape == (B, H, 1)
    f32 = jnp.float32
    cdt = compute_dtype

    if block_b is None:
        tb = _pick_block_b(B, S, H,
                           act_bytes=jnp.dtype(activation_dtype).itemsize)
    else:
        tb = block_b
    assert tb == B or (B % tb == 0 and tb % 8 == 0), (B, tb)
    grid_b = B // tb

    # One-time layout plumbing (outside the kernel): sequence-major activations
    # so all in-kernel contractions over H are transpose-free.
    all_sh = jnp.transpose(all_hidden, (0, 2, 1)).astype(cdt)    # (B, S, H)
    dec = origin_hidden[:, :, 0].astype(cdt)                     # (B, H)

    W = params["W_attn"]                                         # (H, 2H)
    was_t = W[:, :H].T.astype(cdt)                               # (H, H) static half
    # fused decoder-side weight: [attention decoder half^T | fc1 decoder half]
    wdec = jnp.concatenate([W[:, H:].T, params["w1t"][:H, :]],
                           axis=1).astype(cdt)                   # (H, 2H)
    w1b = params["w1t"][H:, :].astype(cdt)                       # (H, H) context half
    w2 = params["w2t"].astype(cdt)                               # (H, H)
    va = params["v_attn"].astype(f32)                            # (1, H) VPU operand
    vp = params["v_ptr"].astype(f32)                             # (1, H) VPU operand
    b1 = params["b1"].astype(f32)                                # (1, H)
    b2 = params["b2"].astype(f32)                                # (1, H)

    def const_spec(shape):
        return pl.BlockSpec(shape, lambda b: (0,) * len(shape))

    kernel = functools.partial(pointer_kernel, act_dtype=activation_dtype)

    out = pl.pallas_call(
        kernel,
        out_shape=jax.ShapeDtypeStruct((B, S), jnp.float32),
        grid=(grid_b,),
        in_specs=[
            pl.BlockSpec((tb, S, H), lambda b: (b, 0, 0)),   # all_hidden (seq-major)
            pl.BlockSpec((tb, H), lambda b: (b, 0)),         # origin hidden
            const_spec((H, H)),                              # W_attn static half^T
            const_spec((H, 2 * H)),                          # fused dec-side weight
            const_spec((1, H)),                              # Attention.v
            const_spec((H, H)),                              # fc1 context half
            const_spec((1, H)),                              # fc1 bias
            const_spec((H, H)),                              # fc2 weight^T
            const_spec((1, H)),                              # fc2 bias
            const_spec((1, H)),                              # Pointer.v
        ],
        out_specs=pl.BlockSpec((tb, S), lambda b: (b, 0)),
        compiler_params=pltpu.CompilerParams(
            dimension_semantics=("parallel",),
            vmem_limit_bytes=48 * 1024 * 1024),
    )(all_sh, dec, was_t, wdec, va, w1b, b1, w2, b2, vp)
    return out                                                # (B, S)


# ----------------------------------------------------------------------------
# Pure-JAX f32 reference (mirrors the PyTorch math) for verification.
# ----------------------------------------------------------------------------
def pointer_reference(all_hidden, origin_hidden, params):
    B, H, S = all_hidden.shape
    dec = origin_hidden[:, :, 0]                                              # (B, H)
    hidden = jnp.concatenate(
        [all_hidden, jnp.broadcast_to(dec[:, :, None], (B, H, S))], axis=1)   # (B, 2H, S)
    wh = jnp.tanh(jnp.einsum("hk,bks->bhs", params["W_attn"], hidden))
    logits = jnp.einsum("h,bhs->bs", params["v_attn"][0], wh)[:, None, :]
    attn = jax.nn.softmax(logits, axis=2)                                     # (B, 1, S)
    context = jnp.einsum("bos,bhs->boh", attn, all_hidden)                    # (B, 1, H)
    inp = jnp.concatenate([dec, context[:, 0, :]], axis=1)                    # (B, 2H)
    out1 = jax.nn.relu(inp @ params["w1t"] + params["b1"][0])
    out2 = jax.nn.relu(out1 @ params["w2t"] + params["b2"][0])
    probs = jnp.einsum("h,bhs->bs", params["v_ptr"][0],
                       jnp.tanh(all_hidden + out2[:, :, None]))
    return probs


if __name__ == "__main__":
    B, H, S = 2, 32, 8

    key = jax.random.PRNGKey(0)
    keys = jax.random.split(key, 9)

    # Deterministic synthetic parameters (the module's zero-init would make the
    # output trivially zero, so use small random values).
    scale = 0.1
    params = {
        "W_attn": scale * jax.random.normal(keys[0], (H, 2 * H), jnp.float32),
        "v_attn": scale * jax.random.normal(keys[1], (1, H), jnp.float32),
        "w1t":    scale * jax.random.normal(keys[2], (2 * H, H), jnp.float32),
        "b1":     scale * jax.random.normal(keys[3], (1, H), jnp.float32),
        "w2t":    scale * jax.random.normal(keys[4], (H, H), jnp.float32),
        "b2":     scale * jax.random.normal(keys[5], (1, H), jnp.float32),
        "v_ptr":  scale * jax.random.normal(keys[6], (1, H), jnp.float32),
    }

    all_hidden = jax.random.normal(keys[7], (B, H, S), jnp.float32)
    origin_hidden = jax.random.normal(keys[8], (B, H, 1), jnp.float32)

    probs = pointer_forward(all_hidden, origin_hidden, params)
    probs = jax.block_until_ready(probs)

    ref = pointer_reference(all_hidden, origin_hidden, params)
    assert probs.shape == (B, S), probs.shape
    # bf16 MXU operands / bf16 tanh (f32 accumulation everywhere) -> loosened
    # tolerance vs the pure-f32 reference.
    assert jnp.allclose(probs, ref, atol=5e-2, rtol=5e-2), (probs, ref)

    print("KERNEL_OK")
</pallas_src>

<mosaic_0001>
module attributes {stable_mosaic.version = 11 : i64} {
  func.func @pointer_kernel(%arg0: i32, %arg1: memref<2x8x32xbf16, #tpu.memory_space<vmem>>, %arg2: memref<2x32xbf16, #tpu.memory_space<vmem>>, %arg3: memref<32x32xbf16, #tpu.memory_space<vmem>>, %arg4: memref<32x64xbf16, #tpu.memory_space<vmem>>, %arg5: memref<1x32xf32, #tpu.memory_space<vmem>>, %arg6: memref<32x32xbf16, #tpu.memory_space<vmem>>, %arg7: memref<1x32xf32, #tpu.memory_space<vmem>>, %arg8: memref<32x32xbf16, #tpu.memory_space<vmem>>, %arg9: memref<1x32xf32, #tpu.memory_space<vmem>>, %arg10: memref<1x32xf32, #tpu.memory_space<vmem>>, %arg11: memref<2x8xf32, #tpu.memory_space<vmem>>) attributes {dimension_semantics = [#tpu.dimension_semantics<parallel>], iteration_bounds = array<i64: 1>, scalar_prefetch = 0 : i64, scratch_operands = 0 : i64, tpu.core_type = #tpu.core_type<tc>, window_params = [{transform_indices = @transform_0, window_bounds = array<i64: 2, 8, 32>}, {transform_indices = @transform_1, window_bounds = array<i64: 2, 32>}, {pipeline_mode = #tpu.pipeline_mode<synchronous>, transform_indices = @transform_2, window_bounds = array<i64: 32, 32>}, {pipeline_mode = #tpu.pipeline_mode<synchronous>, transform_indices = @transform_3, window_bounds = array<i64: 32, 64>}, {pipeline_mode = #tpu.pipeline_mode<synchronous>, transform_indices = @transform_4, window_bounds = array<i64: 1, 32>}, {pipeline_mode = #tpu.pipeline_mode<synchronous>, transform_indices = @transform_5, window_bounds = array<i64: 32, 32>}, {pipeline_mode = #tpu.pipeline_mode<synchronous>, transform_indices = @transform_6, window_bounds = array<i64: 1, 32>}, {pipeline_mode = #tpu.pipeline_mode<synchronous>, transform_indices = @transform_7, window_bounds = array<i64: 32, 32>}, {pipeline_mode = #tpu.pipeline_mode<synchronous>, transform_indices = @transform_8, window_bounds = array<i64: 1, 32>}, {pipeline_mode = #tpu.pipeline_mode<synchronous>, transform_indices = @transform_9, window_bounds = array<i64: 1, 32>}, {transform_indices = @transform_10, window_bounds = array<i64: 2, 8>}]} {
    %c0 = arith.constant 0 : index
    %c0_0 = arith.constant 0 : index
    %c0_1 = arith.constant 0 : index
    %0 = vector.load %arg1[%c0, %c0_0, %c0_1] : memref<2x8x32xbf16, #tpu.memory_space<vmem>>, vector<2x8x32xbf16>
    %1 = vector.shape_cast %0 : vector<2x8x32xbf16> to vector<16x32xbf16>
    %c0_2 = arith.constant 0 : index
    %c0_3 = arith.constant 0 : index
    %2 = vector.load %arg2[%c0_2, %c0_3] : memref<2x32xbf16, #tpu.memory_space<vmem>>, vector<2x32xbf16>
    %c0_4 = arith.constant 0 : index
    %c0_5 = arith.constant 0 : index
    %3 = vector.load %arg3[%c0_4, %c0_5] : memref<32x32xbf16, #tpu.memory_space<vmem>>, vector<32x32xbf16>
    %cst = arith.constant dense<0.000000e+00> : vector<16x32xf32>
    %4 = tpu.matmul %1, %3, %cst {dimension_numbers = #tpu.dot_dimension_numbers<[1], [0], [0], [1], [0, 0, 1, 1], [], []>} : vector<16x32xbf16>, vector<32x32xbf16>, vector<16x32xf32> -> vector<16x32xf32>
    %c0_6 = arith.constant 0 : index
    %c0_7 = arith.constant 0 : index
    %5 = vector.load %arg4[%c0_6, %c0_7] : memref<32x64xbf16, #tpu.memory_space<vmem>>, vector<32x64xbf16>
    %cst_8 = arith.constant dense<0.000000e+00> : vector<2x64xf32>
    %6 = tpu.matmul %2, %5, %cst_8 {dimension_numbers = #tpu.dot_dimension_numbers<[1], [0], [0], [1], [0, 0, 1, 1], [], []>} : vector<2x32xbf16>, vector<32x64xbf16>, vector<2x64xf32> -> vector<2x64xf32>
    %7 = vector.extract_strided_slice %6 {offsets = [0, 0], sizes = [2, 32], strides = [1, 1]} : vector<2x64xf32> to vector<2x32xf32>
    %8 = vector.extract_strided_slice %6 {offsets = [0, 32], sizes = [2, 32], strides = [1, 1]} : vector<2x64xf32> to vector<2x32xf32>
    %9 = vector.shape_cast %4 : vector<16x32xf32> to vector<2x8x32xf32>
    %10 = vector.shape_cast %7 : vector<2x32xf32> to vector<2x1x32xf32>
    %11 = vector.broadcast %10 : vector<2x1x32xf32> to vector<2x8x32xf32>
    %12 = arith.addf %9, %11 : vector<2x8x32xf32>
    %13 = arith.truncf %12 : vector<2x8x32xf32> to vector<2x8x32xbf16>
    %14 = math.tanh %13 : vector<2x8x32xbf16>
    %15 = arith.extf %14 : vector<2x8x32xbf16> to vector<2x8x32xf32>
    %c0_9 = arith.constant 0 : index
    %c0_10 = arith.constant 0 : index
    %16 = vector.load %arg5[%c0_9, %c0_10] : memref<1x32xf32, #tpu.memory_space<vmem>>, vector<1x32xf32>
    %17 = vector.shape_cast %16 : vector<1x32xf32> to vector<1x1x32xf32>
    %18 = vector.broadcast %17 : vector<1x1x32xf32> to vector<2x8x32xf32>
    %19 = arith.mulf %15, %18 : vector<2x8x32xf32>
    %cst_11 = arith.constant dense<0.000000e+00> : vector<2x8xf32>
    %20 = vector.multi_reduction <add>, %19, %cst_11 [2] : vector<2x8x32xf32> to vector<2x8xf32>
    %cst_12 = arith.constant dense<0xFF800000> : vector<2xf32>
    %21 = vector.multi_reduction <maximumf>, %20, %cst_12 [1] : vector<2x8xf32> to vector<2xf32>
    %22 = vector.shape_cast %21 : vector<2xf32> to vector<2x1xf32>
    %23 = vector.broadcast %22 : vector<2x1xf32> to vector<2x8xf32>
    %24 = arith.subf %20, %23 : vector<2x8xf32>
    %25 = math.exp %24 : vector<2x8xf32>
    %cst_13 = arith.constant dense<0.000000e+00> : vector<2xf32>
    %26 = vector.multi_reduction <add>, %25, %cst_13 [1] : vector<2x8xf32> to vector<2xf32>
    %27 = vector.shape_cast %26 : vector<2xf32> to vector<2x1xf32>
    %cst_14 = arith.constant 1.000000e+00 : f32
    %28 = vector.broadcast %cst_14 : f32 to vector<2x1xf32>
    %29 = arith.divf %28, %27 : vector<2x1xf32>
    %30 = vector.broadcast %29 : vector<2x1xf32> to vector<2x8xf32>
    %31 = arith.mulf %25, %30 : vector<2x8xf32>
    %32 = vector.shape_cast %31 : vector<2x8xf32> to vector<2x8x1xf32>
    %33 = arith.extf %0 : vector<2x8x32xbf16> to vector<2x8x32xf32>
    %34 = vector.broadcast %32 : vector<2x8x1xf32> to vector<2x8x32xf32>
    %35 = arith.mulf %34, %33 : vector<2x8x32xf32>
    %cst_15 = arith.constant dense<0.000000e+00> : vector<2x32xf32>
    %36 = vector.multi_reduction <add>, %35, %cst_15 [1] : vector<2x8x32xf32> to vector<2x32xf32>
    %37 = arith.truncf %36 : vector<2x32xf32> to vector<2x32xbf16>
    %c0_16 = arith.constant 0 : index
    %c0_17 = arith.constant 0 : index
    %38 = vector.load %arg6[%c0_16, %c0_17] : memref<32x32xbf16, #tpu.memory_space<vmem>>, vector<32x32xbf16>
    %cst_18 = arith.constant dense<0.000000e+00> : vector<2x32xf32>
    %39 = tpu.matmul %37, %38, %cst_18 {dimension_numbers = #tpu.dot_dimension_numbers<[1], [0], [0], [1], [0, 0, 1, 1], [], []>} : vector<2x32xbf16>, vector<32x32xbf16>, vector<2x32xf32> -> vector<2x32xf32>
    %40 = arith.addf %8, %39 : vector<2x32xf32>
    %c0_19 = arith.constant 0 : index
    %c0_20 = arith.constant 0 : index
    %41 = vector.load %arg7[%c0_19, %c0_20] : memref<1x32xf32, #tpu.memory_space<vmem>>, vector<1x32xf32>
    %42 = vector.broadcast %41 : vector<1x32xf32> to vector<2x32xf32>
    %43 = arith.addf %40, %42 : vector<2x32xf32>
    %cst_21 = arith.constant 0.000000e+00 : f32
    %44 = vector.broadcast %cst_21 : f32 to vector<2x32xf32>
    %45 = arith.maximumf %43, %44 : vector<2x32xf32>
    %46 = arith.truncf %45 : vector<2x32xf32> to vector<2x32xbf16>
    %c0_22 = arith.constant 0 : index
    %c0_23 = arith.constant 0 : index
    %47 = vector.load %arg8[%c0_22, %c0_23] : memref<32x32xbf16, #tpu.memory_space<vmem>>, vector<32x32xbf16>
    %cst_24 = arith.constant dense<0.000000e+00> : vector<2x32xf32>
    %48 = tpu.matmul %46, %47, %cst_24 {dimension_numbers = #tpu.dot_dimension_numbers<[1], [0], [0], [1], [0, 0, 1, 1], [], []>} : vector<2x32xbf16>, vector<32x32xbf16>, vector<2x32xf32> -> vector<2x32xf32>
    %c0_25 = arith.constant 0 : index
    %c0_26 = arith.constant 0 : index
    %49 = vector.load %arg9[%c0_25, %c0_26] : memref<1x32xf32, #tpu.memory_space<vmem>>, vector<1x32xf32>
    %50 = vector.broadcast %49 : vector<1x32xf32> to vector<2x32xf32>
    %51 = arith.addf %48, %50 : vector<2x32xf32>
    %cst_27 = arith.constant 0.000000e+00 : f32
    %52 = vector.broadcast %cst_27 : f32 to vector<2x32xf32>
    %53 = arith.maximumf %51, %52 : vector<2x32xf32>
    %54 = arith.truncf %53 : vector<2x32xf32> to vector<2x32xbf16>
    %55 = vector.shape_cast %54 : vector<2x32xbf16> to vector<2x1x32xbf16>
    %56 = vector.broadcast %55 : vector<2x1x32xbf16> to vector<2x8x32xbf16>
    %57 = arith.addf %0, %56 : vector<2x8x32xbf16>
    %58 = math.tanh %57 : vector<2x8x32xbf16>
    %59 = arith.extf %58 : vector<2x8x32xbf16> to vector<2x8x32xf32>
    %c0_28 = arith.constant 0 : index
    %c0_29 = arith.constant 0 : index
    %60 = vector.load %arg10[%c0_28, %c0_29] : memref<1x32xf32, #tpu.memory_space<vmem>>, vector<1x32xf32>
    %61 = vector.shape_cast %60 : vector<1x32xf32> to vector<1x1x32xf32>
    %62 = vector.broadcast %61 : vector<1x1x32xf32> to vector<2x8x32xf32>
    %63 = arith.mulf %59, %62 : vector<2x8x32xf32>
    %cst_30 = arith.constant dense<0.000000e+00> : vector<2x8xf32>
    %64 = vector.multi_reduction <add>, %63, %cst_30 [2] : vector<2x8x32xf32> to vector<2x8xf32>
    %c0_31 = arith.constant 0 : index
    %c0_32 = arith.constant 0 : index
    %65 = vector.load %arg11[%c0_31, %c0_32] : memref<2x8xf32, #tpu.memory_space<vmem>>, vector<2x8xf32>
    tpu.vector_store %arg11[%c0_31, %c0_32], %64 {strides = array<i32>} : memref<2x8xf32, #tpu.memory_space<vmem>>, vector<2x8xf32>,
    return
  }
  func.func @transform_0(%arg0: i32) -> (i32, i32, i32) {
    %c0_i32 = arith.constant 0 : i32
    %c0_i32_0 = arith.constant 0 : i32
    %c0_i32_1 = arith.constant 0 : i32
    return %arg0, %c0_i32, %c0_i32_0 : i32, i32, i32
  }
  func.func @transform_1(%arg0: i32) -> (i32, i32) {
    %c0_i32 = arith.constant 0 : i32
    %c0_i32_0 = arith.constant 0 : i32
    return %arg0, %c0_i32 : i32, i32
  }
  func.func @transform_2(%arg0: i32) -> (i32, i32) {
    %c0_i32 = arith.constant 0 : i32
    %c0_i32_0 = arith.constant 0 : i32
    %c0_i32_1 = arith.constant 0 : i32
    return %c0_i32, %c0_i32_0 : i32, i32
  }
  func.func @transform_3(%arg0: i32) -> (i32, i32) {
    %c0_i32 = arith.constant 0 : i32
    %c0_i32_0 = arith.constant 0 : i32
    %c0_i32_1 = arith.constant 0 : i32
    return %c0_i32, %c0_i32_0 : i32, i32
  }
  func.func @transform_4(%arg0: i32) -> (i32, i32) {
    %c0_i32 = arith.constant 0 : i32
    %c0_i32_0 = arith.constant 0 : i32
    %c0_i32_1 = arith.constant 0 : i32
    return %c0_i32, %c0_i32_0 : i32, i32
  }
  func.func @transform_5(%arg0: i32) -> (i32, i32) {
    %c0_i32 = arith.constant 0 : i32
    %c0_i32_0 = arith.constant 0 : i32
    %c0_i32_1 = arith.constant 0 : i32
    return %c0_i32, %c0_i32_0 : i32, i32
  }
  func.func @transform_6(%arg0: i32) -> (i32, i32) {
    %c0_i32 = arith.constant 0 : i32
    %c0_i32_0 = arith.constant 0 : i32
    %c0_i32_1 = arith.constant 0 : i32
    return %c0_i32, %c0_i32_0 : i32, i32
  }
  func.func @transform_7(%arg0: i32) -> (i32, i32) {
    %c0_i32 = arith.constant 0 : i32
    %c0_i32_0 = arith.constant 0 : i32
    %c0_i32_1 = arith.constant 0 : i32
    return %c0_i32, %c0_i32_0 : i32, i32
  }
  func.func @transform_8(%arg0: i32) -> (i32, i32) {
    %c0_i32 = arith.constant 0 : i32
    %c0_i32_0 = arith.constant 0 : i32
    %c0_i32_1 = arith.constant 0 : i32
    return %c0_i32, %c0_i32_0 : i32, i32
  }
  func.func @transform_9(%arg0: i32) -> (i32, i32) {
    %c0_i32 = arith.constant 0 : i32
    %c0_i32_0 = arith.constant 0 : i32
    %c0_i32_1 = arith.constant 0 : i32
    return %c0_i32, %c0_i32_0 : i32, i32
  }
  func.func @transform_10(%arg0: i32) -> (i32, i32) {
    %c0_i32 = arith.constant 0 : i32
    %c0_i32_0 = arith.constant 0 : i32
    return %arg0, %c0_i32 : i32, i32
  }
}

</mosaic_0001>

<bundles_post_ra>
// kernel: tpu_custom_call.1
= control target key start
LH: loop header
LB: loop body
LE: loop exit
PB: predicated region body
PF: predicated region fallthrough
CT: control target
= control target key end

     0   :  { %15 = vsyncpa [#allocation3], 0  ;;  %s1060_s0 = inlined_call_operand.hbm [shape: bf16[2,8,32], index: 0, kind: input, shape index: {}]   ;;  %s1061_s1 = inlined_call_operand.vmem [shape: bf16[2,32], index: 1, kind: input, shape index: {}]   ;;  %s1062_s2 = inlined_call_operand.hbm [shape: bf16[32,32], index: 2, kind: input, shape index: {}]   ;;  %s1063_s3 = inlined_call_operand.hbm [shape: bf16[32,64], index: 3, kind: input, shape index: {}]   ;;  %s1064_s4 = inlined_call_operand.vmem [shape: f32[1,32], index: 4, kind: input, shape index: {}]   ;;  %s1065_s5 = inlined_call_operand.hbm [shape: bf16[32,32], index: 5, kind: input, shape index: {}]   ;;  %s1066_s6 = inlined_call_operand.vmem [shape: f32[1,32], index: 6, kind: input, shape index: {}]   ;;  %s1067_s7 = inlined_call_operand.hbm [shape: bf16[32,32], index: 7, kind: input, shape index: {}]   ;;  %s1068_s8 = inlined_call_operand.vmem [shape: f32[1,32], index: 8, kind: input, shape index: {}]   ;;  %s1069_s9 = inlined_call_operand.vmem [shape: f32[1,32], index: 9, kind: input, shape index: {}]   ;;  %s1070_s10 = inlined_call_operand.hbm [shape: f32[2,8], index: 10, kind: output, shape index: {}]  }
   0x1   :  { %16 = vsyncpa [#allocation6], 0 }
   0x2   :  { %17 = vsyncpa [#allocation9], 0 }
   0x3   :  { %18 = vsyncpa [#allocation4], 0  ;;  %s865_s13 = smov [#allocation5]   ;;  %s866_s15 = smov [#allocation8]  }
   0x4   :  { %s38_s14 = sshll.u32 %s865_s13, 4  ;;  %s64_s16 = sshll.u32 %s866_s15, 4  ;;  %s39_s14 = int_to_ptr.vmem [resolvable:$true] %s38_s14  ;;  %s65_s16 = int_to_ptr.vmem [resolvable:$true] %s64_s16 }
   0x5   :  { %s745_s17 = scalar_lea.vmem %s39_s14, 256  ;;  %p750_p1 = scmp.lt.s32.totalorder %s39_s14, %s39_s14 }
   0x6   :  { %p746_p0 = scmp.ne.s32.totalorder %s39_s14, %s745_s17  ;;  %p751_p2 = scmp.lt.s32.totalorder %s745_s17, %s745_s17 }
   0x8   :  { %p752_p3 = por %p751_p2, %p750_p1 }
   0xa   :  { %p753_p4 = pnand %p752_p3, %p746_p0 }
   0xc   :  { %756 = shalt.err (!%p753_p4)
}
   0xd   :  { %s867_s18 = smov 64   ;;  %s868_s19 = smov 4  }
   0xe   :  { %44 = dma.hbm_to_vmem [thread:$0]  %s1062_s2, 256, %s39_s14, [#allocation6], %s867_s18, %s867_s18, %s868_s19  }
   0xf   :  { %s765_s22 = scalar_lea.vmem %s65_s16, 256  ;;  %p770_p6 = scmp.lt.s32.totalorder %s65_s16, %s65_s16 }
  0x10   :  { %p766_p5 = scmp.ne.s32.totalorder %s65_s16, %s765_s22  ;;  %p771_p7 = scmp.lt.s32.totalorder %s765_s22, %s765_s22 }
  0x12   :  { %p772_p8 = por %p771_p7, %p770_p6 }
  0x14   :  { %p773_p9 = pnand %p772_p8, %p766_p5 }
  0x16   :  { %776 = shalt.err (!%p773_p9)
}
  0x17   :  { %70 = dma.hbm_to_vmem [thread:$0]  %s1065_s5, 256, %s65_s16, [#allocation9], %s867_s18, %s867_s18, %s868_s19  }
  0x18   :  { %s869_s25 = smov [#allocation2]   ;;  %s870_s27 = smov [#allocation7]  }
  0x19   :  { %s24_s26 = sshll.u32 %s869_s25, 4  ;;  %s50_s28 = sshll.u32 %s870_s27, 4  ;;  %s25_s26 = int_to_ptr.vmem [resolvable:$true] %s24_s26  ;;  %s51_s28 = int_to_ptr.vmem [resolvable:$true] %s50_s28 }
  0x1a   :  { %s785_s2 = scalar_lea.vmem %s25_s26, 128  ;;  %p790_p11 = scmp.lt.s32.totalorder %s25_s26, %s25_s26 }
  0x1b   :  { %p786_p10 = scmp.ne.s32.totalorder %s25_s26, %s785_s2  ;;  %p791_p12 = scmp.lt.s32.totalorder %s785_s2, %s785_s2 }
  0x1d   :  { %p792_p13 = por %p791_p12, %p790_p11 }
  0x1f   :  { %p793_p0 = pnand %p792_p13, %p786_p10 }
  0x21   :  { %796 = shalt.err (!%p793_p0)
}
  0x22   :  { %30 = dma.hbm_to_vmem [thread:$0]  %s1060_s0, 128, %s25_s26, [#allocation3], %s867_s18, %s867_s18, %s868_s19  }
  0x23   :  { %s805_s5 = scalar_lea.vmem %s51_s28, 256  ;;  %p810_p2 = scmp.lt.s32.totalorder %s51_s28, %s51_s28 }
  0x24   :  { %p806_p1 = scmp.ne.s32.totalorder %s51_s28, %s805_s5  ;;  %p811_p3 = scmp.lt.s32.totalorder %s805_s5, %s805_s5 }
  0x26   :  { %p812_p4 = por %p811_p3, %p810_p2 }
  0x28   :  { %p813_p5 = pnand %p812_p4, %p806_p1 }
  0x2a   :  { %816 = shalt.err (!%p813_p5)
}
  0x2b   :  { %56 = dma.hbm_to_vmem [thread:$0]  %s1063_s3, 256, %s51_s28, [#allocation6], %s867_s18, %s867_s18, %s868_s19  }
  0x2c   :  { %s871_s13 = smov [#allocation10]  }
  0x2d   :  { %s78_s14 = sshll.u32 %s871_s13, 4  ;;  %s79_s14 = int_to_ptr.vmem [resolvable:$true] %s78_s14 }
  0x2e   :  { %s825_s15 = scalar_lea.vmem %s79_s14, 256  ;;  %p830_p7 = scmp.lt.s32.totalorder %s79_s14, %s79_s14 }
  0x2f   :  { %p826_p6 = scmp.ne.s32.totalorder %s79_s14, %s825_s15  ;;  %p831_p8 = scmp.lt.s32.totalorder %s825_s15, %s825_s15 }
  0x31   :  { %p832_p9 = por %p831_p8, %p830_p7 }
  0x33   :  { %p833_p10 = pnand %p832_p9, %p826_p6 }
  0x35   :  { %836 = shalt.err (!%p833_p10)
}
  0x36   :  { %84 = dma.hbm_to_vmem [thread:$0]  %s1067_s7, 256, %s79_s14, [#allocation9], %s867_s18, %s867_s18, %s868_s19  }
  0x37   :  { %857 = dma.done.wait [#allocation3], 128  }
  0x38   :  { %858 = vsyncadd [#allocation3], 4294967168 }
  0x39   :  { %859 = dma.done.wait [#allocation6], 512  }
  0x3a   :  { %860 = vsyncadd [#allocation6], 4294966784 }
  0x3b   :  { %861 = dma.done.wait [#allocation9], 512  }
  0x3c   :  { %862 = vsyncadd [#allocation9], 4294966784  ;;  %v872_v0 = vmov 0.0   ;;  %vm873_vm0 = vmmov 0   ;;  %v714_v1 = vld [vmem:[#allocation5 + $0x8] sm:$0xff]   ;;  %v715_v2 = vld [vmem:[#allocation7 + $0x8] sm:$0xff]   ;;  %v237_v11 = vlaneseq }
  0x3d   :  { %666 = vmatprep.subr.bf16.mxu0 %v872_v0  ;;  %674 = vmatprep.subr.bf16.mxu1 %v872_v0  ;;  %v716_v3 = vld [vmem:[#allocation5] sm:$0xff]   ;;  %v717_v4 = vld [vmem:[#allocation7] sm:$0xff]   ;;  %v972_v5 = vld [vmem:[#allocation2] sm:$0xf]  ;;  %vm129_vm1 = vcmask 261120   ;;  %vm301_vm2 = vcmask 1041409  }
  0x3e   :  { %670 = vmatprep.mubr.msk.bf16.mxu0 %vm873_vm0, %v872_v0  ;;  %678 = vmatprep.mubr.msk.bf16.mxu1 %vm873_vm0, %v872_v0  ;;  %v974_v6 = vld [vmem:[#allocation2 + $0x4] sm:$0xf]  ;;  %v107_v8 = vld [vmem:[%s1061_s1] sm:$0x1]  ;;  %v874_v9 = vmov 1966171168  }
  0x3f   :  { %667 = vmatpush3.bf16.msra.mxu0 %v714_v1  ;;  %675 = vmatpush3.bf16.msra.mxu1 %v715_v2  ;;  %v636_v7 = vcombine.low %v972_v5, %v974_v6  ;;  %v235_v10 = vunpack.c.l.s4 %v874_v9  ;;  %v989_v13 = vshrl.u32 %v237_v11, 7  ;;  %v643_v35 = vld [vmem:[%s1064_s4] ss:$0 sm:$0xff]  ;;  %v292_v43 = vand.u32 127, %v237_v11  ;;  %s876_s19 = smov 32   ;;  %s878_s23 = smov [#allocation11]  }
  0x40   :  { %668 = vmatprep.subr.bf16.mxu0 %v872_v0  ;;  %676 = vmatprep.subr.bf16.mxu1 %v872_v0  ;;  %vm304_vm3 = vcmask 58368   ;;  %v875_v51 = vmov 0   ;;  %s625_s24 = sshll.u32 %s878_s23, 4  ;;  %s626_s24 = int_to_ptr.vmem [resolvable:$true] %s625_s24 }
  0x41   :  { %v236_v12 = vunpack.c.0.s8 %v235_v10  ;;  %v999_v18 = vsub.s32 0, %v989_v13  ;;  %v1011_v45 = vsub.s32 %v292_v43, %v989_v13  ;;  %713 = vset.pattern.permute.xlu0 %v875_v51  ;;  %712 = vset.pattern.permute.xlu1 %v875_v51  ;;  %v315_v52 = vsub.s32 1, %v989_v13  ;;  %p842_p12 = scmp.lt.s32.totalorder %s626_s24, %s626_s24 }
  0x43   :  { %669 = vmatpush3.bf16.msra.mxu0 %v716_v3  ;;  %677 = vmatpush3.bf16.msra.mxu1 %v717_v4  ;;  %v992_v14 = vsub.s32 %v236_v12, %v989_v13  ;;  %v719_v13 = vld [vmem:[#allocation8 + $0x8] sm:$0xff]  }
  0x44   :  { %682 = vmatprep.subr.bf16.mxu0 %v872_v0  ;;  %690 = vmatprep.subr.bf16.mxu1 %v872_v0 }
  0x46   :  { %671 = vmatmul.mubr.msk.bf16.vlgmr.msra.gmra.mxu0 %vm129_vm1, %v636_v7  ;;  %679 = vmatmul.mubr.msk.bf16.vlgmr.msra.gmra.mxu1 %vm129_vm1, %v107_v8 }
  0x47   :  { %686 = vmatprep.mubr.msk.bf16.mxu0 %vm873_vm0, %v872_v0  ;;  %694 = vmatprep.mubr.msk.bf16.mxu1 %vm873_vm0, %v872_v0 }
  0x48   :  { %683 = vmatpush3.bf16.msra.mxu0 %v719_v13 }
  0x49   :  { %684 = vmatprep.subr.bf16.mxu0 %v872_v0 }
 0x106   :  { %v167_v15 = vpop.f32.mrf.mxu0  ;;  %v994_v16 = vpop.f32.mrf.mxu1 }
 0x107   :  { %v240_v17 = vrot.slane %v994_v16, %v992_v14 }
 0x108   :  { %v672_v19 = vpop.f32.mrf.mxu0  ;;  %v680_v20 = vpop.f32.mrf.mxu1 }
 0x109   :  { %v241_v21 = vcombine.high %v240_v17, %v240_v17  ;;  %v248_v22 = vrot.slane %v240_v17, %v992_v14  ;;  %v361_v17 = vunpack.c.l.bf16 %v972_v5 }
 0x10a   :  { %v170_v23 = vpop.f32.mrf.mxu0  ;;  %v230_v24 = vpop.f32.mrf.mxu1 }
 0x10b   :  { %v259_v25 = vrot.slane %v248_v22, %v999_v18  ;;  %v255_v26 = vrot.slane %v241_v21, %v992_v14  ;;  %v362_v21 = vunpack.c.l.bf16 %v974_v6 }
 0x10c   :  { %v673_v27 = vpop.f32.mrf.mxu0  ;;  %v681_v28 = vpop.f32.mrf.mxu1 }
 0x10d   :  { %v266_v29 = vadd.f32 %v259_v25, %v167_v15  ;;  %v263_v30 = vrot.slane %v255_v26, %v999_v18  ;;  %v720_v15 = vld [vmem:[#allocation8] sm:$0xff]  }
 0x10e   :  { %685 = vmatpush3.bf16.msra.mxu0 %v720_v15 }
 0x10f   :  { %v267_v31 = vadd.f32 %v263_v30, %v170_v23  ;;  %v268_v32 = vpack.c.bf16 %v266_v29, %v266_v29 }
 0x111   :  { %v269_v33 = vpack.c.bf16 %v267_v31, %v267_v31  ;;  %723 = vtanh.bf16 %v268_v32 }
 0x113   :  { %725 = vtanh.bf16 %v269_v33 }
 0x11f   :  { %v724_v34 = vpop.eup %723 }
 0x120   :  { %v272_v36 = vunpack.c.l.bf16 %v724_v34 }
 0x121   :  { %v726_v37 = vpop.eup %725 }
 0x122   :  { %v281_v38 = vmul.f32 %v643_v35, %v272_v36  ;;  %v273_v39 = vunpack.c.l.bf16 %v726_v37 }
 0x124   :  { %v283_v40 = vsel %vm129_vm1, %v281_v38, 0.0  ;;  %v282_v41 = vmul.f32 %v643_v35, %v273_v39 }
 0x125   :  { %284 = vadd.xlane.f32.xlu0 %v283_v40 }
 0x126   :  { %v286_v42 = vsel %vm129_vm1, %v282_v41, 0.0 }
 0x129   :  { %287 = vadd.xlane.f32.xlu0 %v286_v42 }
 0x1ae   :  { %v285_v44 = vpop.xlane.xlu0 %284 }
 0x1af   :  { %v296_v47 = vrot.slane %v285_v44, %v1011_v45 }
 0x1b2   :  { %v288_v46 = vpop.xlane.xlu0 %287 }
 0x1b3   :  { %v300_v48 = vrot.slane %v288_v46, %v1011_v45 }
 0x1b5   :  { %v302_v49 = vsel %vm301_vm2, %v300_v48, %v296_v47  ;;  %v722_v47 = vld [vmem:[#allocation10] sm:$0xff]  }
 0x1b6   :  { %v305_v50 = vsel %vm304_vm3, %v302_v49, -inf }
 0x1b7   :  { %306 = vmax.xlane.f32.xlu1 %v305_v50 }
 0x240   :  { %v307_v53 = vpop.xlane.xlu1 %306 }
 0x241   :  { %v312_v54 = vrot.slane %v307_v53, %v999_v18  ;;  %v316_v55 = vrot.slane %v307_v53, %v315_v52 }
 0x243   :  { %v319_v56 = vsub.f32 %v285_v44, %v312_v54  ;;  %v320_v57 = vsub.f32 %v288_v46, %v316_v55  ;;  %v647_v44 = vld [vmem:[%s1066_s6] ss:$0 sm:$0xff]  ;;  %s877_s6 = smov 96  }
 0x244   :  { %v721_v46 = vld [vmem:[#allocation10 + $0x8] sm:$0xff]  }
 0x245   :  { %v321_v58 = vmul.f32 1.442695, %v319_v56  ;;  %v323_v59 = vmul.f32 1.442695, %v320_v57  ;;  %691 = vmatpush3.bf16.msra.mxu1 %v721_v46 }
 0x246   :  { %692 = vmatprep.subr.bf16.mxu1 %v872_v0  ;;  %v648_v0 = vld [vmem:[%s1068_s8] ss:$0 sm:$0xff] }
 0x247   :  { %727 = vpow2.f32 %v321_v58 }
 0x248   :  { %729 = vpow2.f32 %v323_v59 }
 0x249   :  { %693 = vmatpush3.bf16.msra.mxu1 %v722_v47 }
 0x254   :  { %v728_v60 = vpop.eup %727 }
 0x255   :  { %v730_v61 = vpop.eup %729  ;;  %328 = vperm.xlu1 %712, %v728_v60  }
 0x256   :  { %331 = vperm.xlu0 %713, %v730_v61  }
 0x2d0   :  { %v329_v62 = vpop.permute.xlu1 %328 }
 0x2d1   :  { %v332_v63 = vpop.permute.xlu0 %331  ;;  %v336_v1 = vrot.slane %v329_v62, %v1011_v45 }
 0x2d2   :  { %v340_v2 = vrot.slane %v332_v63, %v1011_v45 }
 0x2d4   :  { %v341_v3 = vsel %vm301_vm2, %v340_v2, %v336_v1 }
 0x2d5   :  { %v343_v4 = vsel %vm304_vm3, %v341_v3, 0.0 }
 0x2d6   :  { %344 = vadd.xlane.f32.xlu1 %v343_v4 }
 0x35f   :  { %v345_v7 = vpop.xlane.xlu1 %344 }
 0x360   :  { %731 = vrcp.f32 %v345_v7 }
 0x36d   :  { %v732_v8 = vpop.eup %731 }
 0x36e   :  { %v352_v9 = vrot.slane %v732_v8, %v999_v18  ;;  %v356_v11 = vrot.slane %v732_v8, %v315_v52 }
 0x370   :  { %v359_v10 = vmul.f32 %v728_v60, %v352_v9  ;;  %v360_v12 = vmul.f32 %v730_v61, %v356_v11 }
 0x372   :  { %365 = vperm.xlu0 %713, %v359_v10  }
 0x376   :  { %370 = vperm.xlu0 %713, %v360_v12  }
 0x37a   :  { %467 = vrot.lane.b32.xlu0 %v647_v44, %s876_s19 }
 0x3ed   :  { %v366_v19 = vpop.permute.xlu0 %365 }
 0x3ee   :  { %v373_v20 = vmul.f32 %v366_v19, %v361_v17 }
 0x3f0   :  { %v375_v22 = vsel %vm129_vm1, %v373_v20, 0.0  ;;  %v653_v20 = vld [vmem:[%s1069_s9] ss:$0 sm:$0xff]  ;;  %s837_s9 = scalar_lea.vmem %s626_s24, 32 }
 0x3f1   :  { %v376_v23 = vrot.slane %v375_v22, 4  ;;  %v371_v24 = vpop.permute.xlu0 %370  ;;  %p838_p11 = scmp.ne.s32.totalorder %s626_s24, %s837_s9  ;;  %p843_p13 = scmp.lt.s32.totalorder %s837_s9, %s837_s9 }
 0x3f2   :  { %v374_v25 = vmul.f32 %v371_v24, %v362_v21 }
 0x3f3   :  { %v377_v26 = vadd.f32 %v376_v23, %v375_v22  ;;  %p844_p0 = por %p843_p13, %p842_p12 }
 0x3f4   :  { %v382_v27 = vsel %vm129_vm1, %v374_v25, 0.0 }
 0x3f5   :  { %v378_v28 = vrot.slane %v377_v26, 2  ;;  %v383_v29 = vrot.slane %v382_v27, 4  ;;  %v468_v53 = vpop.permute.xlu0 %467  ;;  %p845_p1 = pnand %p844_p0, %p838_p11 }
 0x3f7   :  { %v379_v30 = vadd.f32 %v378_v28, %v377_v26  ;;  %v384_v31 = vadd.f32 %v383_v29, %v382_v27 }
 0x3f9   :  { %v380_v32 = vrot.slane %v379_v30, 1  ;;  %v385_v33 = vrot.slane %v384_v31, 2 }
 0x3fb   :  { %v381_v34 = vadd.f32 %v380_v32, %v379_v30  ;;  %v386_v35 = vadd.f32 %v385_v33, %v384_v31 }
 0x3fd   :  { %v387_v36 = vrot.slane %v386_v35, 1  ;;  %v389_v37 = vpack.c.bf16 %v381_v34, %v381_v34 }
 0x3ff   :  { %v388_v38 = vadd.f32 %v387_v36, %v386_v35  ;;  %v397_v40 = vunpack.c.l.b16 %v389_v37 }
 0x401   :  { %v390_v39 = vpack.c.bf16 %v388_v38, %v388_v38 }
 0x403   :  { %v398_v41 = vunpack.c.l.b16 %v390_v39 }
 0x405   :  { %v399_v42 = vsel %vm301_vm2, %v398_v41, %v397_v40 }
 0x406   :  { %v400_v43 = vpack.c.b16 %v399_v42, %v399_v42 }
 0x408   :  { %687 = vmatmul.mubr.msk.bf16.vlgmr.msra.gmra.mxu0 %vm129_vm1, %v400_v43 }
 0x4c8   :  { %v450_v48 = vpop.f32.mrf.mxu0 }
 0x4c9   :  { %457 = vrot.lane.b32.xlu1 %v450_v48, %s876_s19 }
 0x4ca   :  { %v688_v49 = vpop.f32.mrf.mxu0 }
 0x4cc   :  { %v453_v50 = vpop.f32.mrf.mxu0 }
 0x4ce   :  { %v689_v51 = vpop.f32.mrf.mxu0 }
 0x53b   :  { %v458_v52 = vpop.permute.xlu1 %457 }
 0x53c   :  { %v460_v54 = vadd.f32 %v458_v52, %v994_v16 }
 0x53e   :  { %v470_v55 = vadd.f32 %v468_v53, %v460_v54 }
 0x540   :  { %v471_v56 = vmax.f32 %v470_v55, 0.0 }
 0x542   :  { %v472_v57 = vpack.c.bf16 %v471_v56, %v471_v56 }
 0x544   :  { %485 = vrot.lane.b32.xlu0 %v472_v57, %s877_s6 }
 0x5b6   :  { %v486_v58 = vpop.permute.xlu0 %485 }
 0x5b7   :  { %695 = vmatmul.mubr.msk.bf16.vlgmr.msra.gmra.mxu1 %vm129_vm1, %v486_v58 }
 0x677   :  { %v536_v59 = vpop.f32.mrf.mxu1 }
 0x678   :  { %v537_v60 = vadd.f32 %v648_v0, %v536_v59 }
 0x679   :  { %v696_v61 = vpop.f32.mrf.mxu1 }
 0x67a   :  { %v542_v62 = vmax.f32 %v537_v60, 0.0 }
 0x67b   :  { %v539_v63 = vpop.f32.mrf.mxu1 }
 0x67c   :  { %v543_v1 = vpack.c.bf16 %v542_v62, %v542_v62 }
 0x67d   :  { %v697_v2 = vpop.f32.mrf.mxu1 }
 0x67e   :  { %v551_v16 = vrot.slane %v543_v1, %v992_v14 }
 0x680   :  { %v558_v3 = vrot.slane %v551_v16, %v992_v14 }
 0x682   :  { %v560_v4 = vunpack.i.h.s16 %v558_v3  ;;  %v652_v7 = vpack.i.b16 %v558_v3, %v558_v3 }
 0x684   :  { %v562_v8 = vpack.i.b16 %v560_v4, %v560_v4  ;;  %v566_v9 = vrot.slane %v652_v7, %v999_v18 }
 0x686   :  { %v570_v10 = vrot.slane %v562_v8, %v999_v18  ;;  %v572_v11 = vpack.i.b16 %v566_v9, %v566_v9 }
 0x688   :  { %v579_v12 = vpack.i.b16 %v570_v10, %v570_v10  ;;  %v577_v13 = vrot.slane %v572_v11, %v999_v18 }
 0x68a   :  { %v585_v15 = vadd.bf16 %v577_v13, %v972_v5  ;;  %v584_v17 = vrot.slane %v579_v12, %v999_v18 }
 0x68c   :  { %733 = vtanh.bf16 %v585_v15  ;;  %v586_v19 = vadd.bf16 %v584_v17, %v974_v6 }
 0x68e   :  { %735 = vtanh.bf16 %v586_v19 }
 0x69a   :  { %v734_v14 = vpop.eup %733 }
 0x69b   :  { %v589_v21 = vunpack.c.l.bf16 %v734_v14 }
 0x69c   :  { %v736_v22 = vpop.eup %735 }
 0x69d   :  { %v598_v23 = vmul.f32 %v653_v20, %v589_v21  ;;  %v590_v24 = vunpack.c.l.bf16 %v736_v22 }
 0x69f   :  { %v600_v25 = vsel %vm129_vm1, %v598_v23, 0.0  ;;  %v599_v26 = vmul.f32 %v653_v20, %v590_v24 }
 0x6a0   :  { %601 = vadd.xlane.f32.xlu0 %v600_v25 }
 0x6a1   :  { %v603_v5 = vsel %vm129_vm1, %v599_v26, 0.0 }
 0x6a2   :  { %604 = vadd.xlane.f32.xlu1 %v603_v5 }
 0x729   :  { %v602_v18 = vpop.xlane.xlu0 %601 }
 0x72a   :  { %v611_v27 = vrot.slane %v602_v18, %v1011_v45 }
 0x72b   :  { %v605_v6 = vpop.xlane.xlu1 %604 }
 0x72c   :  { %v615_v28 = vrot.slane %v605_v6, %v1011_v45 }
 0x72e   :  { %v616_v29 = vsel %vm301_vm2, %v615_v28, %v611_v27 }
 0x72f   :  { %618 = vst.msk [vmem:[#allocation11] sm:$0x3] %vm304_vm3, %v616_v29 }
 0x730   :  { %848 = shalt.err (!%p845_p1)
}
 0x731   :  { %628 = dma.vmem_to_hbm [thread:$0]  %s626_s24, 32, %s1070_s10, [#allocation4]  }
 0x732   :  { %863 = dma.done.wait [#allocation4], 32  }
 0x733   :  { %864 = vsyncadd [#allocation4], 4294967264 }
 0x734   :  { %632 = vsyncpa [#allocation3], 1 }
 0x735   :  { %633 = vsyncpa [#allocation6], 1 }
 0x736   :  { %634 = vsyncpa [#allocation9], 1 }
 0x737   :  { %635 = vsyncpa [#allocation4], 1 }

</bundles_post_ra>
